<compile_context>
chip_gen: v7x
topology: tpu7x:2x2x1
jax: 0.10.0
libtpu: 0.0.40
codegen_flags: <defaults>
</compile_context>

<pallas_src>
import functools

import jax
import jax.numpy as jnp
from jax import lax
from jax.experimental import pallas as pl
from jax.experimental.pallas import tpu as pltpu


def _sepconv_kernel(x_ref, wdw_ref, wpw_ref, o_ref, *,
                    kh, kw, h_out, w_out, c_in, c_out):
    # x_ref:   (1, Hp, Wp*Cin)                 flat padded input slab for one batch element
    # wdw_ref: (kh*kw, W_out*Cin)              pre-tiled per-tap depthwise weights
    # wpw_ref: (W_out*Cin, W_out*Cout)         block-diagonal pointwise weight
    # o_ref:   (1, H_out, W_out*Cout)          lane-dense output slab
    x = x_ref[0]              # (Hp, Wp*Cin); no blanket cast (f32 inputs stay as-is)
    wdw = wdw_ref[...]        # read the depthwise weights ONCE (hoisted out of the tap loop)

    lanes_in = w_out * c_in

    # tap (0, 0) initializes the accumulator (avoids a zeros broadcast + add)
    acc = x[0:h_out, 0:lanes_in] * wdw[0:1]
    # remaining kh*kw - 1 taps: stride-1 depthwise conv == shifted elementwise MACs.
    # The kj shift is a contiguous lane-offset slice, the ki shift a sublane slice (pure VPU).
    for t in range(1, kh * kw):
        ki, kj = divmod(t, kw)
        patch = x[ki:ki + h_out, kj * c_in: kj * c_in + lanes_in]
        acc = acc + patch * wdw[t:t + 1]

    # pointwise 1x1 conv in the lane-dense layout: (H_out, W_out*Cin) x (W_out*Cin, W_out*Cout)
    out = jnp.dot(acc.astype(jnp.float32), wpw_ref[...],
                  preferred_element_type=jnp.float32)

    # activation: ReLU (fbrs usage passes activation='relu'; norm_layer=None -> Identity)
    out = jnp.maximum(out, 0.0)

    o_ref[0] = out.astype(o_ref.dtype)


def separable_conv2d(x_nchw, w_dw, w_pw, *, dw_padding, dw_stride=1):
    """x_nchw: (N, Cin, H, W); w_dw: (Cin, 1, kh, kw); w_pw: (Cout, Cin, 1, 1)."""
    n, c_in, h, w = x_nchw.shape
    c_out = w_pw.shape[0]
    kh, kw = w_dw.shape[2], w_dw.shape[3]
    pad = dw_padding

    if dw_stride != 1:
        # TODO(synk): the lane-flattened tap-slice trick only holds for stride==1; strided
        # configs fall back to the XLA conv path (not used by the fbrs SeparableConv2d default).
        return _reference(x_nchw, w_dw, w_pw, dw_padding=pad, dw_stride=dw_stride)

    h_out = h + 2 * pad - kh + 1
    w_out = w + 2 * pad - kw + 1

    # glue: layout change + zero-padding + channel flattening in plain JAX
    x_nhwc = jnp.transpose(x_nchw, (0, 2, 3, 1))                       # (N, H, W, Cin)
    x_pad = jnp.pad(x_nhwc, ((0, 0), (pad, pad), (pad, pad), (0, 0)))  # (N, Hp, Wp, Cin)
    hp, wp = x_pad.shape[1], x_pad.shape[2]
    x_flat = x_pad.reshape(n, hp, wp * c_in)                           # (N, Hp, Wp*Cin)

    # depthwise weights: (Cin,1,kh,kw) -> (kh*kw, Cin) -> tiled lane-dense (kh*kw, W_out*Cin)
    wdw_taps = jnp.transpose(w_dw[:, 0, :, :], (1, 2, 0)).reshape(kh * kw, c_in)
    wdw_taps = jnp.tile(wdw_taps, (1, w_out)).astype(jnp.float32)      # [t, j*Cin + c] = w[c,t]

    # pointwise weights: (Cout,Cin,1,1) -> (Cin,Cout) -> block-diagonal (W_out*Cin, W_out*Cout)
    wpw_mat = jnp.transpose(w_pw[:, :, 0, 0], (1, 0)).astype(jnp.float32)
    wpw_bd = jnp.kron(jnp.eye(w_out, dtype=jnp.float32), wpw_mat)      # (W_out*Cin, W_out*Cout)

    kernel = functools.partial(
        _sepconv_kernel, kh=kh, kw=kw,
        h_out=h_out, w_out=w_out, c_in=c_in, c_out=c_out)

    out_flat = pl.pallas_call(
        kernel,
        out_shape=jax.ShapeDtypeStruct((n, h_out, w_out * c_out), x_nchw.dtype),
        grid_spec=pltpu.PrefetchScalarGridSpec(
            num_scalar_prefetch=0,
            grid=(n,),  # batch axis stays parallel -> both TCs busy on v7x
            in_specs=[
                pl.BlockSpec((1, hp, wp * c_in), lambda b: (b, 0, 0)),
                # constant index_map -> weights DMA'd once, not per grid step
                pl.BlockSpec((kh * kw, w_out * c_in), lambda b: (0, 0)),
                pl.BlockSpec((w_out * c_in, w_out * c_out), lambda b: (0, 0)),
            ],
            out_specs=pl.BlockSpec((1, h_out, w_out * c_out),
                                   lambda b: (b, 0, 0)),
        ),
        compiler_params=pltpu.CompilerParams(
            dimension_semantics=("parallel",),
            vmem_limit_bytes=32 * 1024 * 1024,
        ),
    )(x_flat, wdw_taps, wpw_bd)

    out_nhwc = out_flat.reshape(n, h_out, w_out, c_out)
    return jnp.transpose(out_nhwc, (0, 3, 1, 2))  # back to NCHW


def _reference(x_nchw, w_dw, w_pw, *, dw_padding, dw_stride=1):
    c_in = x_nchw.shape[1]
    dn = lax.conv_dimension_numbers(x_nchw.shape, w_dw.shape,
                                    ("NCHW", "OIHW", "NCHW"))
    dw = lax.conv_general_dilated(
        x_nchw, w_dw, window_strides=(dw_stride, dw_stride),
        padding=[(dw_padding, dw_padding)] * 2,
        dimension_numbers=dn, feature_group_count=c_in)
    pw = lax.conv_general_dilated(
        dw, w_pw, window_strides=(1, 1), padding="VALID",
        dimension_numbers=lax.conv_dimension_numbers(
            dw.shape, w_pw.shape, ("NCHW", "OIHW", "NCHW")))
    return jnp.maximum(pw, 0.0)


if __name__ == "__main__":
    # SeparableConv2d(in_channels=4, out_channels=8, dw_kernel=3, dw_padding=1,
    #                 dw_stride=1, activation='relu', use_bias=False, norm_layer=None)
    N, C_IN, C_OUT, H, W = 2, 4, 8, 16, 16
    KH = KW = 3
    PAD = 1
    STRIDE = 1

    key = jax.random.PRNGKey(0)
    kx, kdw, kpw = jax.random.split(key, 3)
    x = jax.random.normal(kx, (N, C_IN, H, W), dtype=jnp.float32)
    # PyTorch weight shapes: depthwise (Cin, 1, kh, kw), pointwise (Cout, Cin, 1, 1)
    w_dw = jax.random.normal(kdw, (C_IN, 1, KH, KW), dtype=jnp.float32) * 0.1
    w_pw = jax.random.normal(kpw, (C_OUT, C_IN, 1, 1), dtype=jnp.float32) * 0.1

    out = separable_conv2d(x, w_dw, w_pw, dw_padding=PAD, dw_stride=STRIDE)
    out = jax.block_until_ready(out)

    ref = _reference(x, w_dw, w_pw, dw_padding=PAD, dw_stride=STRIDE)
    assert out.shape == (N, C_OUT, H, W), out.shape
    assert jnp.allclose(out, ref, atol=1e-5, rtol=1e-5), "mismatch vs lax.conv reference"

    print("KERNEL_OK")
</pallas_src>

<mosaic_0001>
module attributes {stable_mosaic.version = 11 : i64} {
  func.func @_sepconv_kernel(%arg0: i32, %arg1: memref<1x18x72xf32, #tpu.memory_space<vmem>>, %arg2: memref<9x64xf32, #tpu.memory_space<vmem>>, %arg3: memref<64x128xf32, #tpu.memory_space<vmem>>, %arg4: memref<1x16x128xf32, #tpu.memory_space<vmem>>) attributes {dimension_semantics = [#tpu.dimension_semantics<parallel>], iteration_bounds = array<i64: 2>, scalar_prefetch = 0 : i64, scratch_operands = 0 : i64, tpu.core_type = #tpu.core_type<tc>, window_params = [{transform_indices = @transform_0, window_bounds = array<i64: 1, 18, 72>}, {pipeline_mode = #tpu.pipeline_mode<synchronous>, transform_indices = @transform_1, window_bounds = array<i64: 9, 64>}, {pipeline_mode = #tpu.pipeline_mode<synchronous>, transform_indices = @transform_2, window_bounds = array<i64: 64, 128>}, {transform_indices = @transform_3, window_bounds = array<i64: 1, 16, 128>}]} {
    %c0 = arith.constant 0 : index
    %c0_0 = arith.constant 0 : index
    %c0_1 = arith.constant 0 : index
    %0 = vector.load %arg1[%c0, %c0_0, %c0_1] : memref<1x18x72xf32, #tpu.memory_space<vmem>>, vector<1x18x72xf32>
    %1 = vector.shape_cast %0 : vector<1x18x72xf32> to vector<18x72xf32>
    %c0_2 = arith.constant 0 : index
    %c0_3 = arith.constant 0 : index
    %2 = vector.load %arg2[%c0_2, %c0_3] : memref<9x64xf32, #tpu.memory_space<vmem>>, vector<9x64xf32>
    %3 = vector.extract_strided_slice %1 {offsets = [0, 0], sizes = [16, 64], strides = [1, 1]} : vector<18x72xf32> to vector<16x64xf32>
    %4 = vector.extract_strided_slice %2 {offsets = [0, 0], sizes = [1, 64], strides = [1, 1]} : vector<9x64xf32> to vector<1x64xf32>
    %5 = vector.broadcast %4 : vector<1x64xf32> to vector<16x64xf32>
    %6 = arith.mulf %3, %5 : vector<16x64xf32>
    %7 = vector.extract_strided_slice %1 {offsets = [0, 4], sizes = [16, 64], strides = [1, 1]} : vector<18x72xf32> to vector<16x64xf32>
    %8 = vector.extract_strided_slice %2 {offsets = [1, 0], sizes = [1, 64], strides = [1, 1]} : vector<9x64xf32> to vector<1x64xf32>
    %9 = vector.broadcast %8 : vector<1x64xf32> to vector<16x64xf32>
    %10 = arith.mulf %7, %9 : vector<16x64xf32>
    %11 = arith.addf %6, %10 : vector<16x64xf32>
    %12 = vector.extract_strided_slice %1 {offsets = [0, 8], sizes = [16, 64], strides = [1, 1]} : vector<18x72xf32> to vector<16x64xf32>
    %13 = vector.extract_strided_slice %2 {offsets = [2, 0], sizes = [1, 64], strides = [1, 1]} : vector<9x64xf32> to vector<1x64xf32>
    %14 = vector.broadcast %13 : vector<1x64xf32> to vector<16x64xf32>
    %15 = arith.mulf %12, %14 : vector<16x64xf32>
    %16 = arith.addf %11, %15 : vector<16x64xf32>
    %17 = vector.extract_strided_slice %1 {offsets = [1, 0], sizes = [16, 64], strides = [1, 1]} : vector<18x72xf32> to vector<16x64xf32>
    %18 = vector.extract_strided_slice %2 {offsets = [3, 0], sizes = [1, 64], strides = [1, 1]} : vector<9x64xf32> to vector<1x64xf32>
    %19 = vector.broadcast %18 : vector<1x64xf32> to vector<16x64xf32>
    %20 = arith.mulf %17, %19 : vector<16x64xf32>
    %21 = arith.addf %16, %20 : vector<16x64xf32>
    %22 = vector.extract_strided_slice %1 {offsets = [1, 4], sizes = [16, 64], strides = [1, 1]} : vector<18x72xf32> to vector<16x64xf32>
    %23 = vector.extract_strided_slice %2 {offsets = [4, 0], sizes = [1, 64], strides = [1, 1]} : vector<9x64xf32> to vector<1x64xf32>
    %24 = vector.broadcast %23 : vector<1x64xf32> to vector<16x64xf32>
    %25 = arith.mulf %22, %24 : vector<16x64xf32>
    %26 = arith.addf %21, %25 : vector<16x64xf32>
    %27 = vector.extract_strided_slice %1 {offsets = [1, 8], sizes = [16, 64], strides = [1, 1]} : vector<18x72xf32> to vector<16x64xf32>
    %28 = vector.extract_strided_slice %2 {offsets = [5, 0], sizes = [1, 64], strides = [1, 1]} : vector<9x64xf32> to vector<1x64xf32>
    %29 = vector.broadcast %28 : vector<1x64xf32> to vector<16x64xf32>
    %30 = arith.mulf %27, %29 : vector<16x64xf32>
    %31 = arith.addf %26, %30 : vector<16x64xf32>
    %32 = vector.extract_strided_slice %1 {offsets = [2, 0], sizes = [16, 64], strides = [1, 1]} : vector<18x72xf32> to vector<16x64xf32>
    %33 = vector.extract_strided_slice %2 {offsets = [6, 0], sizes = [1, 64], strides = [1, 1]} : vector<9x64xf32> to vector<1x64xf32>
    %34 = vector.broadcast %33 : vector<1x64xf32> to vector<16x64xf32>
    %35 = arith.mulf %32, %34 : vector<16x64xf32>
    %36 = arith.addf %31, %35 : vector<16x64xf32>
    %37 = vector.extract_strided_slice %1 {offsets = [2, 4], sizes = [16, 64], strides = [1, 1]} : vector<18x72xf32> to vector<16x64xf32>
    %38 = vector.extract_strided_slice %2 {offsets = [7, 0], sizes = [1, 64], strides = [1, 1]} : vector<9x64xf32> to vector<1x64xf32>
    %39 = vector.broadcast %38 : vector<1x64xf32> to vector<16x64xf32>
    %40 = arith.mulf %37, %39 : vector<16x64xf32>
    %41 = arith.addf %36, %40 : vector<16x64xf32>
    %42 = vector.extract_strided_slice %1 {offsets = [2, 8], sizes = [16, 64], strides = [1, 1]} : vector<18x72xf32> to vector<16x64xf32>
    %43 = vector.extract_strided_slice %2 {offsets = [8, 0], sizes = [1, 64], strides = [1, 1]} : vector<9x64xf32> to vector<1x64xf32>
    %44 = vector.broadcast %43 : vector<1x64xf32> to vector<16x64xf32>
    %45 = arith.mulf %42, %44 : vector<16x64xf32>
    %46 = arith.addf %41, %45 : vector<16x64xf32>
    %c0_4 = arith.constant 0 : index
    %c0_5 = arith.constant 0 : index
    %47 = vector.load %arg3[%c0_4, %c0_5] : memref<64x128xf32, #tpu.memory_space<vmem>>, vector<64x128xf32>
    %cst = arith.constant dense<0.000000e+00> : vector<16x128xf32>
    %48 = tpu.matmul %46, %47, %cst {dimension_numbers = #tpu.dot_dimension_numbers<[1], [0], [0], [1], [0, 0, 1, 1], [], []>} : vector<16x64xf32>, vector<64x128xf32>, vector<16x128xf32> -> vector<16x128xf32>
    %cst_6 = arith.constant 0.000000e+00 : f32
    %49 = vector.broadcast %cst_6 : f32 to vector<16x128xf32>
    %50 = arith.maximumf %48, %49 : vector<16x128xf32>
    %c0_7 = arith.constant 0 : index
    %c0_8 = arith.constant 0 : index
    %c0_9 = arith.constant 0 : index
    %51 = vector.load %arg4[%c0_7, %c0_8, %c0_9] : memref<1x16x128xf32, #tpu.memory_space<vmem>>, vector<1x16x128xf32>
    %52 = vector.shape_cast %51 : vector<1x16x128xf32> to vector<16x128xf32>
    %53 = vector.shape_cast %50 : vector<16x128xf32> to vector<1x16x128xf32>
    tpu.vector_store %arg4[%c0_7, %c0_8, %c0_9], %53 {strides = array<i32>} : memref<1x16x128xf32, #tpu.memory_space<vmem>>, vector<1x16x128xf32>,
    return
  }
  func.func @transform_0(%arg0: i32) -> (i32, i32, i32) {
    %c0_i32 = arith.constant 0 : i32
    %c0_i32_0 = arith.constant 0 : i32
    %c0_i32_1 = arith.constant 0 : i32
    return %arg0, %c0_i32, %c0_i32_0 : i32, i32, i32
  }
  func.func @transform_1(%arg0: i32) -> (i32, i32) {
    %c0_i32 = arith.constant 0 : i32
    %c0_i32_0 = arith.constant 0 : i32
    %c0_i32_1 = arith.constant 0 : i32
    return %c0_i32, %c0_i32_0 : i32, i32
  }
  func.func @transform_2(%arg0: i32) -> (i32, i32) {
    %c0_i32 = arith.constant 0 : i32
    %c0_i32_0 = arith.constant 0 : i32
    %c0_i32_1 = arith.constant 0 : i32
    return %c0_i32, %c0_i32_0 : i32, i32
  }
  func.func @transform_3(%arg0: i32) -> (i32, i32, i32) {
    %c0_i32 = arith.constant 0 : i32
    %c0_i32_0 = arith.constant 0 : i32
    %c0_i32_1 = arith.constant 0 : i32
    return %arg0, %c0_i32, %c0_i32_0 : i32, i32, i32
  }
}

</mosaic_0001>

<bundles_post_ra>
// kernel: tpu_custom_call.1
= control target key start
LH: loop header
LB: loop body
LE: loop exit
PB: predicated region body
PF: predicated region fallthrough
CT: control target
= control target key end

     0   :  { %8 = vsyncpa [#allocation3], 0  ;;  %s956_s0 = inlined_call_operand.vmem [shape: f32[2,18,72], index: 0, kind: input, shape index: {}]   ;;  %s957_s1 = inlined_call_operand.vmem [shape: f32[9,64], index: 1, kind: input, shape index: {}]   ;;  %s958_s2 = inlined_call_operand.vmem [shape: f32[64,128], index: 2, kind: input, shape index: {}]   ;;  %s959_s3 = inlined_call_operand.hbm [shape: f32[2,16,128], index: 3, kind: output, shape index: {}]  }
   0x1   :  { %10 = vsyncpa [#allocation3 + $0x1], 0  ;;  %s733_s12 = smov 0   ;;  %s735_s13 = smov 0  }
   0x2   :  { %s737_s14 = smov 0   ;;  %s739_s15 = smov 0  }
   0x3 LB: > { %s754_s16 = sadd.s32 4294967295, %s705_s15   ;;  %s538_s17 = sadd.s32 4294967294, %s705_s15   ;;  %s705_s15 = sphi %s739_s15, %s965_s15   ;;  %s701_s14 = sphi %s737_s14, %s964_s14   ;;  %s697_s13 = sphi %s735_s13, %s963_s13   ;;  %s693_s12 = sphi %s733_s12, %s962_s12  }
   0x4   : > { %s758_s18 = sadd.s32 1, %s705_s15   ;;  %s91_s19 = sadd.s32 1, %s701_s14 }
   0x5   : > { %s88_s20 = ssub.s32 %s705_s15, %s758_s18  ;;  %p101_p0 = scmp.ne.s32.totalorder %s701_s14, %s697_s13 }
   0x6   : > { %p89_p1 = scmp.eq.s32.totalorder %s88_s20, 0  ;;  %p102_p2 = scmp.eq.s32.totalorder %s754_s16, 1 }
   0x7   : > { %p107_p3 = scmp.ne.s32.totalorder %s697_s13, %s693_s12  ;;  %p108_p4 = scmp.eq.s32.totalorder %s538_s17, 1 }
   0x8   : > { %s769_s21 = scalar_select %p89_p1, %s701_s14, %s91_s19  }
   0x9   : > { %p771_p5 = por %p102_p2, %p101_p0  ;;  %p775_p6 = por %p108_p4, %p107_p3 }
   0xa   : > { %p541_p7 = scmp.ge.s32.totalorder %s705_s15, 1  ;;  %p140_p8 = scmp.lt.s32.totalorder %s705_s15, 3 }
   0xc   : > { %p141_p9 = pnand %p541_p7, %p140_p8 }
   0xd   : > { %v174_v0 = vlaneseq (!%p141_p9)  ;;  %v786_v2 = vld [vmem:[%s957_s1] sm:$0xff] (!%p141_p9)  ;;  %s707_s26 = smov (!%p141_p9), 4   ;;  %s708_s27 = smov (!%p141_p9), 8   ;;  %v544_v13 = vld [vmem:[%s957_s1 + $0x8] ss:$0 sm:$0xff] (!%p141_p9)  ;;  %vm230_vm0 = vcmask (!%p141_p9), 1046528  }
   0xe   : > { %144 = sbr.rel (%p141_p9) target bundleno = 506 (0x1fa), region = 32  ;;  %p164_p10 = scmp.lt.s32.totalorder (!%p141_p9), %s754_s16, 1  ;;  %v368_v25 = vld [vmem:[%s958_s2] sm:$0xff] (!%p141_p9)  ;;  %v369_v26 = vld [vmem:[%s958_s2 + $0x8] sm:$0xff] (!%p141_p9)  ;;  %v370_v32 = vld [vmem:[%s958_s2 + $0x10] sm:$0xff] (!%p141_p9)  ;;  %vm304_vm1 = vcmask (!%p141_p9), 1045504  }
   0xf   : > { %v781_v1 = vshrl.u32 (!%p141_p9), %v174_v0, 7  ;;  %v582_v27 = vpack.c.bf16 (!%p141_p9), %v369_v26, %v368_v25  ;;  %v371_v33 = vld [vmem:[%s958_s2 + $0x18] sm:$0xff] (!%p141_p9)  ;;  %v372_v45 = vld [vmem:[%s958_s2 + $0x20] sm:$0xff] (!%p141_p9)  ;;  %v373_v46 = vld [vmem:[%s958_s2 + $0x28] sm:$0xff] (!%p141_p9)  ;;  %s710_s8 = smov (!%p141_p9), 120   ;;  %vm376_vm2 = vcmask (!%p141_p9), 523264  }
  0x10   : > { %v586_v34 = vpack.c.bf16 (!%p141_p9), %v371_v33, %v370_v32  ;;  %v590_v51 = vpack.c.bf16 (!%p141_p9), %v373_v46, %v372_v45  ;;  %v374_v63 = vld [vmem:[%s958_s2 + $0x30] sm:$0xff] (!%p141_p9)  ;;  %v375_v0 = vld [vmem:[%s958_s2 + $0x38] sm:$0xff] (!%p141_p9)  ;;  %s161_s9 = sand.u32 (!%p141_p9), 1, %s697_s13   ;;  %s552_s19 = sshll.u32 (!%p141_p9), %s754_s16, 8 }
  0x11   : > { %v182_v3 = vsub.s32 (!%p141_p9), 1, %v781_v1  ;;  %v202_v4 = vsub.s32 (!%p141_p9), 2, %v781_v1  ;;  %v242_v5 = vsub.s32 (!%p141_p9), 4, %v781_v1  ;;  %v269_v6 = vsub.s32 (!%p141_p9), 5, %v781_v1  ;;  %583 = vmatprep.subr.bf16.mxu0 (!%p141_p9), %v582_v27  ;;  %s542_s10 = sshll.u32 (!%p141_p9), %s161_s9, 4  ;;  %s912_s25 = scalar_lea.hbm (!%p141_p9), %s959_s3, %s552_s19 }
  0x12   : > { %v316_v11 = vsub.s32 (!%p141_p9), 7, %v781_v1  ;;  %v222_v14 = vsub.s32 (!%p141_p9), 3, %v781_v1  ;;  %v296_v30 = vsub.s32 (!%p141_p9), 6, %v781_v1  ;;  %585 = vmatpush3.bf16.msra.mxu0 (!%p141_p9), %v582_v27  ;;  %s163_s11 = scalar_lea.vmem (!%p141_p9), [#allocation2], %s542_s10 }
  0x13   : > { %v183_v7 = vrot.slane (!%p141_p9), %v786_v2, %v182_v3  ;;  %v243_v8 = vrot.slane (!%p141_p9), %v786_v2, %v242_v5  ;;  %v203_v9 = vrot.slane (!%p141_p9), %v786_v2, %v202_v4  ;;  %v270_v10 = vrot.slane (!%p141_p9), %v786_v2, %v269_v6  ;;  %587 = vmatprep.subr.bf16.mxu0 (!%p141_p9), %v586_v34  ;;  %s476_s17 = sshll.u32 (!%p141_p9), %s163_s11, 4  ;;  %s907_s17 = int_to_ptr.vmem [resolvable:$true] %s476_s17 }
  0x14   : > { %v317_v12 = vrot.slane (!%p141_p9), %v786_v2, %v316_v11  ;;  %v223_v15 = vrot.slane (!%p141_p9), %v786_v2, %v222_v14  ;;  %v297_v31 = vrot.slane (!%p141_p9), %v786_v2, %v296_v30  ;;  %v594_v5 = vpack.c.bf16 (!%p141_p9), %v375_v0, %v374_v63  ;;  %s643_s28 = scalar_lea.vmem (!%p141_p9), %s907_s17, 256 }
  0x15   : > { %185 = vrot.lane.b32.xlu0 %v183_v7, %s707_s26  ;;  %245 = vrot.lane.b32.xlu1 %v243_v8, %s707_s26  ;;  %s165_s30 = scalar_select %p164_p10, %s754_s16, 1 }
  0x16   : > { %589 = vmatpush3.bf16.msra.mxu0 %v586_v34  ;;  %p644_p11 = scmp.ne.s32.totalorder %s907_s17, %s643_s28  ;;  %s711_s16 = smov [#allocation2]  }
  0x17   : > { %s598_s4 = smul.u32 24, %s165_s30  ;;  %s709_s30 = smov 124   ;;  %591 = vmatprep.subr.bf16.mxu0 %v590_v51 }
  0x18   : > { %p645_p12 = pnand %p644_p11, %p771_p5  ;;  %s647_s29 = sshll.u32 %s711_s16, 4  ;;  %s648_s29 = int_to_ptr.vmem [resolvable:$false] %s647_s29 }
  0x19   : > { %205 = vrot.lane.b32.xlu0 %v203_v9, %s708_s27  ;;  %272 = vrot.lane.b32.xlu1 %v270_v10, %s708_s27  ;;  %s168_s7 = scalar_lea.vmem %s956_s0, %s598_s4  ;;  %p650_p0 = scmp.lt.s32.totalorder %s907_s17, %s648_s29 }
  0x1a   : > { %v811_v16 = vld [vmem:[%s168_s7] sm:$0xff]  ;;  %v813_v17 = vld [vmem:[%s168_s7 + $0x8] sm:$0xff]  ;;  %v815_v18 = vld [vmem:[%s168_s7 + $0x10] sm:$0x3]  ;;  %593 = vmatpush3.bf16.msra.mxu0 %v590_v51  ;;  %p646_p13 = pneg %p645_p12 }
  0x1b   : > { %v225_v19 = vmul.f32 %v223_v15, %v813_v17  ;;  %v226_v20 = vmul.f32 %v223_v15, %v815_v18  ;;  %v224_v21 = vmul.f32 %v223_v15, %v811_v16  ;;  %v299_v35 = vmul.f32 %v297_v31, %v813_v17  ;;  %595 = vmatprep.subr.bf16.mxu0 %v594_v5 }
  0x1c   : > { %v300_v36 = vmul.f32 %v297_v31, %v815_v18  ;;  %v298_v37 = vmul.f32 %v297_v31, %v811_v16 }
  0x1d   : > { %319 = vrot.lane.b32.xlu0 %v317_v12, %s707_s26  ;;  %346 = vrot.lane.b32.xlu1 %v544_v13, %s708_s27  ;;  %v232_v22 = vrot.slane %v225_v19, 1  ;;  %v234_v23 = vrot.slane %v226_v20, 1  ;;  %v231_v24 = vrot.slane %v224_v21, 1  ;;  %v306_v47 = vrot.slane %v299_v35, 2  ;;  %s914_s26 = scalar_lea.sflag [#allocation3], %s161_s9 }
  0x1e   : > { %v308_v48 = vrot.slane %v300_v36, 2  ;;  %v305_v49 = vrot.slane %v298_v37, 2  ;;  %597 = vmatpush3.bf16.msra.mxu0 %v594_v5 }
  0x1f   : > { %v827_v28 = vsel %vm230_vm0, %v232_v22, %v234_v23  ;;  %v830_v29 = vsel %vm230_vm0, %v231_v24, %v232_v22 }
  0x20   : > { %v857_v56 = vsel %vm304_vm1, %v306_v47, %v308_v48  ;;  %v860_v57 = vsel %vm304_vm1, %v305_v49, %v306_v47 }
  0x87   : > { %v186_v38 = vpop.permute.xlu0 %185  ;;  %v246_v39 = vpop.permute.xlu1 %245 }
  0x88   : > { %v188_v40 = vmul.f32 %v186_v38, %v811_v16  ;;  %v189_v41 = vmul.f32 %v186_v38, %v813_v17  ;;  %v248_v42 = vmul.f32 %v246_v39, %v811_v16  ;;  %v249_v43 = vmul.f32 %v246_v39, %v813_v17 }
  0x89   : > { %v250_v44 = vmul.f32 %v246_v39, %v815_v18 }
  0x8a   : > { %194 = vrot.lane.b32.xlu1 %v189_v41, %s709_s30  ;;  %192 = vrot.lane.b32.xlu0 %v188_v40, %s709_s30  ;;  %v254_v50 = vrot.slane %v248_v42, 1  ;;  %v255_v53 = vrot.slane %v249_v43, 1 }
  0x8b   : > { %v206_v52 = vpop.permute.xlu0 %205  ;;  %v257_v54 = vrot.slane %v250_v44, 1  ;;  %v273_v55 = vpop.permute.xlu1 %272 }
  0x8c   : > { %v208_v58 = vmul.f32 %v206_v52, %v811_v16  ;;  %v209_v59 = vmul.f32 %v206_v52, %v813_v17  ;;  %v275_v60 = vmul.f32 %v273_v55, %v811_v16  ;;  %v276_v61 = vmul.f32 %v273_v55, %v813_v17 }
  0x8d   : > { %v277_v62 = vmul.f32 %v273_v55, %v815_v18  ;;  %v258_v7 = vsel %vm230_vm0, %v255_v53, %v257_v54  ;;  %v256_v8 = vsel %vm230_vm0, %v254_v50, %v255_v53 }
  0x8e   : > { %214 = vrot.lane.b32.xlu1 %v209_v59, %s710_s8  ;;  %212 = vrot.lane.b32.xlu0 %v208_v58, %s710_s8  ;;  %v281_v3 = vrot.slane %v275_v60, 1  ;;  %v282_v4 = vrot.slane %v276_v61, 1 }
  0x8f   : > { %v284_v6 = vrot.slane %v277_v62, 1  ;;  %v320_v9 = vpop.permute.xlu0 %319  ;;  %v347_v10 = vpop.permute.xlu1 %346 }
  0x90   : > { %v322_v11 = vmul.f32 %v320_v9, %v811_v16  ;;  %v323_v12 = vmul.f32 %v320_v9, %v813_v17  ;;  %v324_v13 = vmul.f32 %v320_v9, %v815_v18  ;;  %v283_v14 = vsel %vm230_vm0, %v281_v3, %v282_v4 }
  0x91   : > { %v285_v15 = vsel %vm230_vm0, %v282_v4, %v284_v6  ;;  %v349_v19 = vmul.f32 %v347_v10, %v811_v16  ;;  %v350_v20 = vmul.f32 %v347_v10, %v813_v17  ;;  %v351_v24 = vmul.f32 %v347_v10, %v815_v18 }
  0x92   : > { %261 = vrot.lane.b32.xlu1 %v258_v7, %s709_s30  ;;  %259 = vrot.lane.b32.xlu0 %v256_v8, %s709_s30  ;;  %v328_v21 = vrot.slane %v322_v11, 2  ;;  %v329_v22 = vrot.slane %v323_v12, 2  ;;  %v331_v23 = vrot.slane %v324_v13, 2  ;;  %v176_v18 = vsub.s32 0, %v781_v1 }
  0x93   : > { %v355_v25 = vrot.slane %v349_v19, 2  ;;  %v356_v26 = vrot.slane %v350_v20, 2  ;;  %v358_v27 = vrot.slane %v351_v24, 2 }
  0x94   : > { %v332_v30 = vsel %vm304_vm1, %v329_v22, %v331_v23  ;;  %v330_v31 = vsel %vm304_vm1, %v328_v21, %v329_v22  ;;  %v177_v34 = vrot.slane %v786_v2, %v176_v18 }
  0x95   : > { %v359_v32 = vsel %vm304_vm1, %v356_v26, %v358_v27  ;;  %v357_v33 = vsel %vm304_vm1, %v355_v25, %v356_v26 }
  0x96   : > { %288 = vrot.lane.b32.xlu1 %v285_v15, %s710_s8  ;;  %286 = vrot.lane.b32.xlu0 %v283_v14, %s710_s8  ;;  %v179_v35 = vmul.f32 %v177_v34, %v813_v17  ;;  %v178_v36 = vmul.f32 %v177_v34, %v811_v16 }
  0x9a   : > { %335 = vrot.lane.b32.xlu1 %v332_v30, %s709_s30  ;;  %333 = vrot.lane.b32.xlu0 %v330_v31, %s709_s30  ;;  %s649_s30 = scalar_lea.vmem %s648_s29, 512 }
  0x9b   : > { %p651_p1 = scmp.lt.s32.totalorder %s649_s30, %s643_s28 }
  0x9d   : > { %p652_p2 = por %p651_p1, %p650_p0 }
  0x9e   : > { %362 = vrot.lane.b32.xlu1 %v359_v32, %s710_s8  ;;  %360 = vrot.lane.b32.xlu0 %v357_v33, %s710_s8 }
  0x9f   : > { %p653_p3 = pnand %p652_p2, %p646_p13 }
  0xfc   : > { %v195_v37 = vpop.permute.xlu1 %194  ;;  %v193_v38 = vpop.permute.xlu0 %192 }
  0xfd   : > { %v199_v39 = vadd.f32 %v195_v37, %v179_v35  ;;  %v198_v40 = vadd.f32 %v193_v38, %v178_v36 }
 0x100   : > { %v215_v41 = vpop.permute.xlu1 %214  ;;  %v213_v42 = vpop.permute.xlu0 %212 }
 0x101   : > { %v219_v43 = vadd.f32 %v215_v41, %v199_v39  ;;  %v218_v44 = vadd.f32 %v213_v42, %v198_v40 }
 0x103   : > { %v239_v45 = vadd.f32 %v827_v28, %v219_v43  ;;  %v238_v46 = vadd.f32 %v830_v29, %v218_v44 }
 0x104   : > { %v262_v47 = vpop.permute.xlu1 %261  ;;  %v260_v1 = vpop.permute.xlu0 %259 }
 0x105   : > { %v266_v48 = vadd.f32 %v262_v47, %v239_v45  ;;  %v265_v2 = vadd.f32 %v260_v1, %v238_v46 }
 0x108   : > { %v289_v49 = vpop.permute.xlu1 %288  ;;  %v287_v17 = vpop.permute.xlu0 %286 }
 0x109   : > { %v293_v16 = vadd.f32 %v289_v49, %v266_v48  ;;  %v292_v50 = vadd.f32 %v287_v17, %v265_v2 }
 0x10b   : > { %v313_v51 = vadd.f32 %v857_v56, %v293_v16  ;;  %v312_v52 = vadd.f32 %v860_v57, %v292_v50 }
 0x10c   : > { %v336_v53 = vpop.permute.xlu1 %335  ;;  %v334_v54 = vpop.permute.xlu0 %333 }
 0x10d   : > { %v340_v55 = vadd.f32 %v336_v53, %v313_v51  ;;  %v339_v28 = vadd.f32 %v334_v54, %v312_v52 }
 0x110   : > { %v363_v58 = vpop.permute.xlu1 %362  ;;  %v361_v29 = vpop.permute.xlu0 %360 }
 0x111   : > { %v367_v59 = vadd.f32 %v363_v58, %v340_v55  ;;  %v366_v60 = vadd.f32 %v361_v29, %v339_v28 }
 0x113   : > { %579 = vmatprep.mubr.msk.f32.mxu0 %vm376_vm2, %v366_v60 }
 0x114   : > { %580 = vmatmul.mubr.msk.f32.vlgmr.msra.gmra.mrb[0].mxu0 %vm376_vm2, %v367_v59 }
 0x1e7   : > { %v581_v56 = vpop.f32.mrb[0].mxu0 }
 0x1e8   : > { %v459_v57 = vmax.f32 %v581_v56, 0.0  ;;  %v449_v61 = vpop.f32.mrb[1].mxu0 }
 0x1e9   : > { %v458_v62 = vmax.f32 %v449_v61, 0.0 }
 0x1ea   : > { %461 = vst [vmem:[%s163_s11 + $0x8] sm:$0xff] %v459_v57 }
 0x1eb   : > { %460 = vst [vmem:[%s163_s11] sm:$0xff] %v458_v62 }
 0x1ec   : > { %656 = shalt.err (!%p653_p3)
}
 0x1ed   : > { %s657_s4 = scalar_lea.hbm %s912_s25, 256  ;;  %s661_s7 = scalar_lea.hbm %s959_s3, 512 }
 0x1ee   : > { %p658_p4 = scmp.ne.s32.totalorder %s912_s25, %s657_s4  ;;  %p662_p9 = scmp.lt.u32.totalorder %s912_s25, %s959_s3 }
 0x1ef   : > { %p663_p10 = scmp.lt.u32.totalorder %s661_s7, %s657_s4  ;;  %p665_p12 = scmp.lt.u32.totalorder %s657_s4, %s912_s25 }
 0x1f0   : > { %p659_p7 = pnand %p658_p4, %p771_p5 }
 0x1f1   : > { %p664_p11 = por %p663_p10, %p662_p9 }
 0x1f2   : > { %p660_p8 = pneg %p659_p7 }
 0x1f3   : > { %p666_p13 = por %p665_p12, %p664_p11 }
 0x1f5   : > { %p667_p0 = pnand %p666_p13, %p660_p8 }
 0x1f7   : > { %670 = shalt.err (!%p667_p0)
}
 0x1f8   : > { %s712_s10 = smov 128  }
 0x1f9   : > { %599 = dma.vmem_to_hbm [thread:$0]  (%p771_p5), %s907_s17, 256, %s912_s25, %s914_s26, %s712_s10, %s712_s10, %s708_s27  }
 0x1fa PF: > { %p605_p1 = scmp.ge.s32.totalorder %s705_s15, 2  ;;  %s491_s11 = sand.u32 1, %s693_s12  }
 0x1fb   : > { %s492_s19 = scalar_lea.sflag [#allocation3], %s491_s11 }
 0x1fc   : > { %p602_p2 = pnand %p605_p1, %p775_p6 }
 0x1fe   : > { %688 = dma.done.wait (!%p602_p2), %s492_s19, 256  }
 0x1ff   : > { %690 = vsyncadd (!%p602_p2), %s492_s19, 4294967040  ;;  %p13_p3 = scmp.ge.s32.totalorder %s758_s18, 4   ;;  %s962_s12 = smov %s697_s13 }
 0x200   : > { %s963_s13 = smov %s701_s14  ;;  %s964_s14 = smov %s769_s21 }
 0x201   : > { %s965_s15 = smov %s758_s18  ;;  %15 = sbr.rel (!%p13_p3) target bundleno = 3 (0x3), region = 67 }
 0x208   :  { %497 = vsyncpa [#allocation3], 1 }
 0x209   :  { %499 = vsyncpa [#allocation3 + $0x1], 1 }

</bundles_post_ra>
